<compile_context>
chip_gen: v7x
topology: tpu7x:2x2x1
jax: 0.10.0
libtpu: 0.0.40
codegen_flags: <defaults>
</compile_context>

<pallas_src>
import functools

import jax
import jax.numpy as jnp
from jax.experimental import pallas as pl
from jax.experimental.pallas import tpu as pltpu

D_MODEL = 5
D_FF = 10
DROPOUT = 0.1  # unused in eval mode

_LANE = 128     # lane width: pad feature dims to this
_SUBLANE = 8    # sublane: token-tile granularity


def _round_up(x: int, m: int) -> int:
    return ((x + m - 1) // m) * m


def ffn_kernel(x_ref, w1_ref, b1_ref, w2_ref, b2_ref, o_ref):
    # x_ref:  (TM, DPM)         padded, lane-dense
    # w1_ref: (DPM, DPF)        (= padded W1^T, resident)
    # b1_ref: (1, DPF)
    # w2_ref: (DPF, DPM)        (= padded W2^T, resident)
    # b2_ref: (1, DPM)
    # o_ref:  (TM, DPM)
    x = x_ref[...]
    h = jnp.dot(x, w1_ref[...], preferred_element_type=jnp.float32) + b1_ref[...]
    h = jnp.maximum(h, 0.0)                      # ReLU (f32 on the VPU — safe on v5e too)
    # dropout (eval mode) -> identity
    y = jnp.dot(h, w2_ref[...], preferred_element_type=jnp.float32) + b2_ref[...]
    o_ref[...] = y.astype(o_ref.dtype)


def prepare_ffn_params(w1, b1, w2, b2):
    """Transpose + zero-pad the PyTorch-layout weights ONCE, outside the hot path.

    w1: (d_ff, d_model), b1: (d_ff,), w2: (d_model, d_ff), b2: (d_model,).
    Returns lane-dense (128-padded) W1^T, b1, W2^T, b2.  Padded columns of the
    biases are zero so padded lanes never leak into real outputs.
    """
    d_ff, d_model = w1.shape
    dpm = _round_up(d_model, _LANE)
    dpf = _round_up(d_ff, _LANE)

    w1t = jnp.zeros((dpm, dpf), jnp.float32).at[:d_model, :d_ff].set(w1.T)
    w2t = jnp.zeros((dpf, dpm), jnp.float32).at[:d_ff, :d_model].set(w2.T)
    b1p = jnp.zeros((1, dpf), jnp.float32).at[0, :d_ff].set(b1)
    b2p = jnp.zeros((1, dpm), jnp.float32).at[0, :d_model].set(b2)
    return w1t, b1p, w2t, b2p


def _choose_tm(n_pad: int, dpm: int, dpf: int, desired: int = 512) -> int:
    """Pick a token tile that fits the per-generation VMEM budget and leaves
    >= 2 grid steps when possible (v7x megacore)."""
    try:
        vmem_bytes = pltpu.get_tpu_info().vmem_capacity_bytes
    except Exception:  # pragma: no cover - conservative fallback (v7x: 64 MiB)
        vmem_bytes = 64 * 1024 * 1024
    budget = vmem_bytes // 4  # headroom: double-buffers, weights, compiler scratch
    # f32 bytes per token row in flight: x tile (2 bufs) + out tile (2 bufs) + h
    per_row = 4 * (2 * dpm + 2 * dpm + dpf)
    tm_cap = max(_SUBLANE, (budget // per_row) // _SUBLANE * _SUBLANE)
    tm = min(desired, tm_cap, _round_up(n_pad, _SUBLANE))
    # Prefer at least 2 grid steps so the "parallel" axis can split across 2 TCs.
    if tm >= n_pad and n_pad > _SUBLANE:
        tm = _round_up(max(n_pad // 2, _SUBLANE), _SUBLANE)
    return max(_SUBLANE, tm)


@functools.partial(jax.jit, static_argnames=("tm",))
def feed_forward_block(x, w1t, b1p, w2t, b2p, *, tm=None):
    """x: (batch, seq, d_model) float32.
    w1t/b1p/w2t/b2p: pre-padded params from prepare_ffn_params (128-lane-dense)."""
    batch, seq, d_model = x.shape
    dpm = w1t.shape[0]
    dpf = w1t.shape[1]
    n = batch * seq

    n_pad0 = _round_up(n, _SUBLANE)
    if tm is None:
        tm = _choose_tm(n_pad0, dpm, dpf)
    n_pad = _round_up(n, tm)
    grid = n_pad // tm

    # Lane-dense, token-padded activation slab.
    x2d = jnp.zeros((n_pad, dpm), x.dtype).at[:n, :d_model].set(x.reshape(n, d_model))

    flops = 2 * n_pad * (dpm * dpf + dpf * dpm)
    bytes_accessed = 4 * (2 * n_pad * dpm + dpm * dpf + dpf * dpm + dpf + dpm)

    out2d = pl.pallas_call(
        ffn_kernel,
        out_shape=jax.ShapeDtypeStruct((n_pad, dpm), x.dtype),
        grid_spec=pltpu.PrefetchScalarGridSpec(
            num_scalar_prefetch=0,
            grid=(grid,),
            in_specs=[
                pl.BlockSpec((tm, dpm), lambda i: (i, 0)),    # x rows (streamed)
                pl.BlockSpec((dpm, dpf), lambda i: (0, 0)),   # W1^T (resident)
                pl.BlockSpec((1, dpf), lambda i: (0, 0)),     # b1
                pl.BlockSpec((dpf, dpm), lambda i: (0, 0)),   # W2^T (resident)
                pl.BlockSpec((1, dpm), lambda i: (0, 0)),     # b2
            ],
            out_specs=pl.BlockSpec((tm, dpm), lambda i: (i, 0)),
        ),
        compiler_params=pltpu.CompilerParams(
            dimension_semantics=("parallel",),
            vmem_limit_bytes=32 * 1024 * 1024,  # raise v5e's 16 MiB default; safe on v6e/v7x
        ),
        cost_estimate=pl.CostEstimate(
            flops=flops, transcendentals=0, bytes_accessed=bytes_accessed),
    )(x2d, w1t, b1p, w2t, b2p)

    # Slice off token padding and feature (lane) padding.
    return out2d[:n, :d_model].reshape(batch, seq, d_model)


def _init_linear(key, out_features, in_features):
    # Deterministic init matching nn.Linear's U(-1/sqrt(in), 1/sqrt(in)) ranges.
    kw, kb = jax.random.split(key)
    bound = 1.0 / (in_features ** 0.5)
    w = jax.random.uniform(kw, (out_features, in_features), jnp.float32,
                           minval=-bound, maxval=bound)
    b = jax.random.uniform(kb, (out_features,), jnp.float32,
                           minval=-bound, maxval=bound)
    return w, b


if __name__ == "__main__":
    key = jax.random.PRNGKey(0)
    kx, k1, k2 = jax.random.split(key, 3)

    batch, seq = 2, 8
    x = jax.random.normal(kx, (batch, seq, D_MODEL), jnp.float32)

    w1, b1 = _init_linear(k1, D_FF, D_MODEL)      # linear_1: d_model -> d_ff
    w2, b2 = _init_linear(k2, D_MODEL, D_FF)      # linear_2: d_ff -> d_model

    # One-time param prep (transpose + 128-lane zero-pad), outside the hot path.
    w1t, b1p, w2t, b2p = prepare_ffn_params(w1, b1, w2, b2)

    out = feed_forward_block(x, w1t, b1p, w2t, b2p)
    out = jax.block_until_ready(out)

    # Pure-JAX reference check (eval-mode dropout == identity).
    ref = jnp.maximum(x @ w1.T + b1, 0.0) @ w2.T + b2
    assert out.shape == ref.shape, "shape mismatch vs reference"
    assert jnp.allclose(out, ref, atol=1e-5, rtol=1e-5), "mismatch vs reference"

    print("KERNEL_OK")
</pallas_src>

<mosaic_0001>
module attributes {stable_mosaic.version = 11 : i64} {
  func.func @ffn_kernel(%arg0: i32, %arg1: memref<8x128xf32, #tpu.memory_space<vmem>>, %arg2: memref<128x128xf32, #tpu.memory_space<vmem>>, %arg3: memref<1x128xf32, #tpu.memory_space<vmem>>, %arg4: memref<128x128xf32, #tpu.memory_space<vmem>>, %arg5: memref<1x128xf32, #tpu.memory_space<vmem>>, %arg6: memref<8x128xf32, #tpu.memory_space<vmem>>) attributes {dimension_semantics = [#tpu.dimension_semantics<parallel>], iteration_bounds = array<i64: 2>, scalar_prefetch = 0 : i64, scratch_operands = 0 : i64, tpu.core_type = #tpu.core_type<tc>, window_params = [{transform_indices = @transform_0, window_bounds = array<i64: 8, 128>}, {pipeline_mode = #tpu.pipeline_mode<synchronous>, transform_indices = @transform_1, window_bounds = array<i64: 128, 128>}, {pipeline_mode = #tpu.pipeline_mode<synchronous>, transform_indices = @transform_2, window_bounds = array<i64: 1, 128>}, {pipeline_mode = #tpu.pipeline_mode<synchronous>, transform_indices = @transform_3, window_bounds = array<i64: 128, 128>}, {pipeline_mode = #tpu.pipeline_mode<synchronous>, transform_indices = @transform_4, window_bounds = array<i64: 1, 128>}, {transform_indices = @transform_5, window_bounds = array<i64: 8, 128>}]} {
    %c0 = arith.constant 0 : index
    %c0_0 = arith.constant 0 : index
    %0 = vector.load %arg1[%c0, %c0_0] : memref<8x128xf32, #tpu.memory_space<vmem>>, vector<8x128xf32>
    %c0_1 = arith.constant 0 : index
    %c0_2 = arith.constant 0 : index
    %1 = vector.load %arg2[%c0_1, %c0_2] : memref<128x128xf32, #tpu.memory_space<vmem>>, vector<128x128xf32>
    %cst = arith.constant dense<0.000000e+00> : vector<8x128xf32>
    %2 = tpu.matmul %0, %1, %cst {dimension_numbers = #tpu.dot_dimension_numbers<[1], [0], [0], [1], [0, 0, 1, 1], [], []>} : vector<8x128xf32>, vector<128x128xf32>, vector<8x128xf32> -> vector<8x128xf32>
    %c0_3 = arith.constant 0 : index
    %c0_4 = arith.constant 0 : index
    %3 = vector.load %arg3[%c0_3, %c0_4] : memref<1x128xf32, #tpu.memory_space<vmem>>, vector<1x128xf32>
    %4 = vector.broadcast %3 : vector<1x128xf32> to vector<8x128xf32>
    %5 = arith.addf %2, %4 : vector<8x128xf32>
    %cst_5 = arith.constant 0.000000e+00 : f32
    %6 = vector.broadcast %cst_5 : f32 to vector<8x128xf32>
    %7 = arith.maximumf %5, %6 : vector<8x128xf32>
    %c0_6 = arith.constant 0 : index
    %c0_7 = arith.constant 0 : index
    %8 = vector.load %arg4[%c0_6, %c0_7] : memref<128x128xf32, #tpu.memory_space<vmem>>, vector<128x128xf32>
    %cst_8 = arith.constant dense<0.000000e+00> : vector<8x128xf32>
    %9 = tpu.matmul %7, %8, %cst_8 {dimension_numbers = #tpu.dot_dimension_numbers<[1], [0], [0], [1], [0, 0, 1, 1], [], []>} : vector<8x128xf32>, vector<128x128xf32>, vector<8x128xf32> -> vector<8x128xf32>
    %c0_9 = arith.constant 0 : index
    %c0_10 = arith.constant 0 : index
    %10 = vector.load %arg5[%c0_9, %c0_10] : memref<1x128xf32, #tpu.memory_space<vmem>>, vector<1x128xf32>
    %11 = vector.broadcast %10 : vector<1x128xf32> to vector<8x128xf32>
    %12 = arith.addf %9, %11 : vector<8x128xf32>
    %c0_11 = arith.constant 0 : index
    %c0_12 = arith.constant 0 : index
    %13 = vector.load %arg6[%c0_11, %c0_12] : memref<8x128xf32, #tpu.memory_space<vmem>>, vector<8x128xf32>
    tpu.vector_store %arg6[%c0_11, %c0_12], %12 {strides = array<i32>} : memref<8x128xf32, #tpu.memory_space<vmem>>, vector<8x128xf32>,
    return
  }
  func.func @transform_0(%arg0: i32) -> (i32, i32) {
    %c0_i32 = arith.constant 0 : i32
    %c0_i32_0 = arith.constant 0 : i32
    return %arg0, %c0_i32 : i32, i32
  }
  func.func @transform_1(%arg0: i32) -> (i32, i32) {
    %c0_i32 = arith.constant 0 : i32
    %c0_i32_0 = arith.constant 0 : i32
    %c0_i32_1 = arith.constant 0 : i32
    return %c0_i32, %c0_i32_0 : i32, i32
  }
  func.func @transform_2(%arg0: i32) -> (i32, i32) {
    %c0_i32 = arith.constant 0 : i32
    %c0_i32_0 = arith.constant 0 : i32
    %c0_i32_1 = arith.constant 0 : i32
    return %c0_i32, %c0_i32_0 : i32, i32
  }
  func.func @transform_3(%arg0: i32) -> (i32, i32) {
    %c0_i32 = arith.constant 0 : i32
    %c0_i32_0 = arith.constant 0 : i32
    %c0_i32_1 = arith.constant 0 : i32
    return %c0_i32, %c0_i32_0 : i32, i32
  }
  func.func @transform_4(%arg0: i32) -> (i32, i32) {
    %c0_i32 = arith.constant 0 : i32
    %c0_i32_0 = arith.constant 0 : i32
    %c0_i32_1 = arith.constant 0 : i32
    return %c0_i32, %c0_i32_0 : i32, i32
  }
  func.func @transform_5(%arg0: i32) -> (i32, i32) {
    %c0_i32 = arith.constant 0 : i32
    %c0_i32_0 = arith.constant 0 : i32
    return %arg0, %c0_i32 : i32, i32
  }
}

</mosaic_0001>

<bundles_post_ra>
// kernel: feed_forward_block.1
= control target key start
LH: loop header
LB: loop body
LE: loop exit
PB: predicated region body
PF: predicated region fallthrough
CT: control target
= control target key end

     0   :  { %10 = vsyncpa [#allocation3], 0  ;;  %s946_s0 = inlined_call_operand.vmem [shape: f32[16,128], index: 0, kind: input, shape index: {}]   ;;  %s947_s1 = inlined_call_operand.hbm [shape: f32[128,128], index: 1, kind: input, shape index: {}]   ;;  %s948_s2 = inlined_call_operand.vmem [shape: f32[1,128], index: 2, kind: input, shape index: {}]   ;;  %s949_s3 = inlined_call_operand.hbm [shape: f32[128,128], index: 3, kind: input, shape index: {}]   ;;  %s950_s4 = inlined_call_operand.vmem [shape: f32[1,128], index: 4, kind: input, shape index: {}]   ;;  %s951_s5 = inlined_call_operand.vmem [shape: f32[16,128], index: 5, kind: output, shape index: {}]  }
   0x1   :  { %11 = vsyncpa [#allocation5], 0  ;;  %s824_s18 = smov 0  }
   0x2 LB: > { %s830_s19 = sadd.s32 4294967295, %s785_s18   ;;  %p516_p0 = scmp.ge.s32.totalorder %s785_s18, 1  ;;  %s785_s18 = sphi %s824_s18, %s17_s18  }
   0x3   : > { %p158_p1 = scmp.lt.s32.totalorder %s785_s18, 3  ;;  %s787_s20 = smov [#allocation2]  }
   0x4   : > { %s170_s21 = sshll.u32 %s787_s20, 4  ;;  %p952_p3 = scmp.eq.s32.totalorder %s830_s19, 0  ;;  %s171_s21 = int_to_ptr.vmem [resolvable:$true] %s170_s21 }
   0x5   : > { %p834_p2 = pnand %p516_p0, %p158_p1  ;;  %s788_s23 = smov [#allocation4]  }
   0x6   : > { %s186_s24 = sshll.u32 %s788_s23, 4  ;;  %s715_s28 = scalar_lea.hbm %s947_s1, 2048  ;;  %s847_s24 = int_to_ptr.vmem [resolvable:$true] %s186_s24 }
   0x7   : > { %s954_s22 = scalar_select %p834_p2, 1, 0 }
   0x8   : > { %p689_p4 = pneg %p834_p2  ;;  %p716_p6 = scmp.ne.s32.totalorder %s947_s1, %s715_s28 }
   0x9   : > { %p722_p10 = scmp.lt.u32.totalorder %s715_s28, %s947_s1 }
   0xa   : > { %p843_p5 = pnand %p952_p3, %p689_p4 }
   0xc   : > { %p717_p7 = pneg %p843_p5 }
   0xe   : > { %p718_p8 = pnand %p717_p7, %p716_p6 }
  0x10   : > { %p719_p9 = pneg %p718_p8 }
  0x12   : > { %p724_p11 = pnand %p722_p10, %p719_p9 }
  0x14   : > { %727 = shalt.err (!%p724_p11)
}
  0x15   : > { %s728_s8 = scalar_lea.vmem %s171_s21, 2048  ;;  %p736_p1 = scmp.lt.s32.totalorder %s171_s21, %s171_s21 }
  0x16   : > { %p729_p12 = scmp.ne.s32.totalorder %s171_s21, %s728_s8  ;;  %p737_p4 = scmp.lt.s32.totalorder %s728_s8, %s728_s8 }
  0x18   : > { %p731_p13 = pnand %p729_p12, %p717_p7  ;;  %p738_p3 = por %p737_p4, %p736_p1 }
  0x1a   : > { %p732_p0 = pneg %p731_p13 }
  0x1c   : > { %p739_p2 = pnand %p738_p3, %p732_p0 }
  0x1e   : > { %742 = shalt.err (!%p739_p2)
}
  0x1f   : > { %s789_s9 = smov 128   ;;  %s790_s10 = smov 8  }
  0x20   : > { %692 = dma.hbm_to_vmem [thread:$0]  (!%p843_p5), %s947_s1, 2048, %s171_s21, [#allocation3], %s789_s9, %s789_s9, %s790_s10  }
  0x21   : > { %s743_s15 = scalar_lea.hbm %s949_s3, 2048 }
  0x22   : > { %p744_p6 = scmp.ne.s32.totalorder %s949_s3, %s743_s15  ;;  %p750_p8 = scmp.lt.u32.totalorder %s743_s15, %s949_s3 }
  0x24   : > { %p746_p2 = pnand %p744_p6, %p717_p7 }
  0x26   : > { %p747_p3 = pneg %p746_p2 }
  0x28   : > { %p752_p9 = pnand %p750_p8, %p747_p3 }
  0x2a   : > { %755 = shalt.err (!%p752_p9)
}
  0x2b   : > { %s756_s21 = scalar_lea.vmem %s847_s24, 2048  ;;  %p764_p13 = scmp.lt.s32.totalorder %s847_s24, %s847_s24 }
  0x2c   : > { %p757_p10 = scmp.ne.s32.totalorder %s847_s24, %s756_s21  ;;  %p765_p0 = scmp.lt.s32.totalorder %s756_s21, %s756_s21 }
  0x2e   : > { %p759_p11 = pnand %p757_p10, %p717_p7  ;;  %p766_p1 = por %p765_p0, %p764_p13 }
  0x30   : > { %p760_p12 = pneg %p759_p11 }
  0x32   : > { %p767_p4 = pnand %p766_p1, %p760_p12 }
  0x34   : > { %770 = shalt.err (!%p767_p4)
}
  0x35   : > { %695 = dma.hbm_to_vmem [thread:$0]  (!%p843_p5), %s949_s3, 2048, %s847_s24, [#allocation5], %s789_s9, %s789_s9, %s790_s10  }
  0x36   : > { %p956_p6 = scmp.ne.s32.totalorder %s954_s22, 0 }
  0x37   : > { %p957_p2 = scmp.eq.s32.totalorder (!%p956_p6), %s830_s19, 0 }
  0x38   : > { %212 = sbr.rel (%p956_p6) target bundleno = 532 (0x214), region = 40 }
  0x3f   : > { %776 = dma.done.wait (%p957_p2), [#allocation3], 2048   ;;  %p958_p7 = pmov %p957_p2 }
  0x40   : > { %p959_p3 = pmov %p957_p2 }
  0x41   : > { %778 = vsyncadd (%p958_p7), [#allocation3], 4294965248 }
  0x42   : > { %780 = dma.done.wait (%p959_p3), [#allocation5], 2048   ;;  %p960_p8 = pmov %p957_p2 }
  0x43   : > { %v791_v0 = vmov 0.0|0.0   ;;  %vm792_vm0 = vmmov 0   ;;  %v793_v1 = vmov 0.0   ;;  %v251_v2 = vld [vmem:[#allocation2] sm:$0xff]  ;;  %v252_v3 = vld [vmem:[#allocation2 + $0x8] sm:$0xff]  ;;  %v253_v4 = vld [vmem:[#allocation2 + $0x10] sm:$0xff] }
  0x44   : > { %782 = vsyncadd (%p960_p8), [#allocation5], 4294965248  ;;  %633 = vmatprep.subr.bf16.mxu0 %v791_v0  ;;  %595 = vmatprep.mubr.msk.f32.mxu0 %vm792_vm0, %v793_v1  ;;  %v634_v5 = vpack.c.bf16 %v252_v3, %v251_v2  ;;  %v254_v6 = vld [vmem:[#allocation2 + $0x18] sm:$0xff]  ;;  %v255_v8 = vld [vmem:[#allocation2 + $0x20] sm:$0xff]  ;;  %p242_p5 = scmp.lt.s32.totalorder %s830_s19, 1 }
  0x45   : > { %657 = vmatprep.subr.bf16.mxu1 %v791_v0  ;;  %630 = vmatprep.mubr.msk.f32.mxu1 %vm792_vm0, %v793_v1  ;;  %v637_v7 = vpack.c.bf16 %v254_v6, %v253_v4  ;;  %v256_v9 = vld [vmem:[#allocation2 + $0x28] sm:$0xff]  ;;  %v345_v10 = vld [vmem:[#allocation4] sm:$0xff]  ;;  %v347_v12 = vld [vmem:[#allocation4 + $0x10] sm:$0xff] }
  0x46   : > { %635 = vmatpush3.bf16.msra.mxu0 %v634_v5  ;;  %v346_v11 = vld [vmem:[#allocation4 + $0x8] sm:$0xff]  ;;  %v348_v13 = vld [vmem:[#allocation4 + $0x18] sm:$0xff]  ;;  %v640_v14 = vpack.c.bf16 %v256_v9, %v255_v8  ;;  %v257_v16 = vld [vmem:[#allocation2 + $0x30] sm:$0xff]  ;;  %s962_s19 = smov (!%p242_p5, %s830_s19), 1 }
  0x47   : > { %636 = vmatprep.subr.bf16.mxu0 %v791_v0  ;;  %v658_v15 = vpack.c.bf16 %v346_v11, %v345_v10  ;;  %v258_v17 = vld [vmem:[#allocation2 + $0x38] sm:$0xff]  ;;  %v661_v18 = vpack.c.bf16 %v348_v13, %v347_v12  ;;  %v349_v19 = vld [vmem:[#allocation4 + $0x20] sm:$0xff]  ;;  %v350_v20 = vld [vmem:[#allocation4 + $0x28] sm:$0xff]  ;;  %s523_s22 = sshll.u32 %s962_s19, 3 }
  0x48   : > { %v643_v21 = vpack.c.bf16 %v258_v17, %v257_v16  ;;  %v259_v22 = vld [vmem:[#allocation2 + $0x40] sm:$0xff]  ;;  %v260_v23 = vld [vmem:[#allocation2 + $0x48] sm:$0xff]  ;;  %v664_v24 = vpack.c.bf16 %v350_v20, %v349_v19  ;;  %v351_v25 = vld [vmem:[#allocation4 + $0x30] sm:$0xff]  ;;  %s245_s28 = scalar_lea.vmem %s946_s0, %s523_s22  ;;  %s249_s10 = scalar_lea.vmem %s951_s5, %s523_s22 }
  0x49   : > { %659 = vmatpush3.bf16.msra.mxu1 %v658_v15  ;;  %v352_v26 = vld [vmem:[#allocation4 + $0x38] sm:$0xff]  ;;  %v646_v27 = vpack.c.bf16 %v260_v23, %v259_v22  ;;  %v261_v28 = vld [vmem:[#allocation2 + $0x50] sm:$0xff]  ;;  %v353_v31 = vld [vmem:[#allocation4 + $0x40] sm:$0xff] }
  0x4a   : > { %638 = vmatpush3.bf16.msra.mxu0 %v637_v7  ;;  %660 = vmatprep.subr.bf16.mxu1 %v791_v0  ;;  %v262_v29 = vld [vmem:[#allocation2 + $0x58] sm:$0xff]  ;;  %v667_v30 = vpack.c.bf16 %v352_v26, %v351_v25  ;;  %v354_v32 = vld [vmem:[#allocation4 + $0x48] sm:$0xff]  ;;  %v263_v34 = vld [vmem:[#allocation2 + $0x60] sm:$0xff] }
  0x4b   : > { %639 = vmatprep.subr.bf16.mxu0 %v791_v0  ;;  %v649_v33 = vpack.c.bf16 %v262_v29, %v261_v28  ;;  %v264_v35 = vld [vmem:[#allocation2 + $0x68] sm:$0xff]  ;;  %v670_v36 = vpack.c.bf16 %v354_v32, %v353_v31  ;;  %v355_v37 = vld [vmem:[#allocation4 + $0x50] sm:$0xff]  ;;  %v356_v38 = vld [vmem:[#allocation4 + $0x58] sm:$0xff] }
  0x4c   : > { %v652_v39 = vpack.c.bf16 %v264_v35, %v263_v34  ;;  %v265_v40 = vld [vmem:[#allocation2 + $0x70] sm:$0xff]  ;;  %v266_v41 = vld [vmem:[#allocation2 + $0x78] sm:$0xff]  ;;  %v673_v42 = vpack.c.bf16 %v356_v38, %v355_v37  ;;  %v357_v43 = vld [vmem:[#allocation4 + $0x60] sm:$0xff] }
  0x4d   : > { %662 = vmatpush3.bf16.msra.mxu1 %v661_v18  ;;  %v358_v44 = vld [vmem:[#allocation4 + $0x68] sm:$0xff]  ;;  %v655_v45 = vpack.c.bf16 %v266_v41, %v265_v40  ;;  %v250_v47 = vld [vmem:[%s245_s28] sm:$0xff]  ;;  %v359_v48 = vld [vmem:[#allocation4 + $0x70] sm:$0xff] }
  0x4e   : > { %641 = vmatpush3.bf16.msra.mxu0 %v640_v14  ;;  %663 = vmatprep.subr.bf16.mxu1 %v791_v0  ;;  %v676_v46 = vpack.c.bf16 %v358_v44, %v357_v43  ;;  %v360_v49 = vld [vmem:[#allocation4 + $0x78] sm:$0xff]  ;;  %v525_v51 = vld [vmem:[%s948_s2] ss:$0 sm:$0xff] }
  0x4f   : > { %642 = vmatprep.subr.bf16.mxu0 %v791_v0  ;;  %v679_v50 = vpack.c.bf16 %v360_v49, %v359_v48  ;;  %v526_v56 = vld [vmem:[%s950_s4] ss:$0 sm:$0xff] }
  0x51   : > { %665 = vmatpush3.bf16.msra.mxu1 %v664_v24 }
  0x52   : > { %644 = vmatpush3.bf16.msra.mxu0 %v643_v21  ;;  %666 = vmatprep.subr.bf16.mxu1 %v791_v0 }
  0x53   : > { %645 = vmatprep.subr.bf16.mxu0 %v791_v0 }
  0x55   : > { %668 = vmatpush3.bf16.msra.mxu1 %v667_v30 }
  0x56   : > { %647 = vmatpush3.bf16.msra.mxu0 %v646_v27  ;;  %669 = vmatprep.subr.bf16.mxu1 %v791_v0 }
  0x57   : > { %648 = vmatprep.subr.bf16.mxu0 %v791_v0 }
  0x59   : > { %671 = vmatpush3.bf16.msra.mxu1 %v670_v36 }
  0x5a   : > { %650 = vmatpush3.bf16.msra.mxu0 %v649_v33  ;;  %672 = vmatprep.subr.bf16.mxu1 %v791_v0 }
  0x5b   : > { %651 = vmatprep.subr.bf16.mxu0 %v791_v0 }
  0x5d   : > { %674 = vmatpush3.bf16.msra.mxu1 %v673_v42 }
  0x5e   : > { %653 = vmatpush3.bf16.msra.mxu0 %v652_v39  ;;  %675 = vmatprep.subr.bf16.mxu1 %v791_v0 }
  0x5f   : > { %654 = vmatprep.subr.bf16.mxu0 %v791_v0 }
  0x61   : > { %677 = vmatpush3.bf16.msra.mxu1 %v676_v46 }
  0x62   : > { %656 = vmatpush3.bf16.msra.mxu0 %v655_v45  ;;  %678 = vmatprep.subr.bf16.mxu1 %v791_v0 }
  0x65   : > { %596 = vmatmul.mubr.f32.vlgmr.msra.gmra.mrb[0].mxu0 %v250_v47  ;;  %680 = vmatpush3.bf16.msra.mxu1 %v679_v50 }
 0x138   : > { %v340_v52 = vpop.f32.mrb[0].mxu0 }
 0x139   : > { %v341_v53 = vadd.f32 %v525_v51, %v340_v52  ;;  %v597_v54 = vpop.f32.mrb[1].mxu0 }
 0x13b   : > { %v344_v55 = vmax.f32 %v341_v53, 0.0 }
 0x13d   : > { %631 = vmatmul.mubr.f32.vlgmr.msra.gmra.mrb[0].mxu1 %v344_v55 }
 0x210   : > { %v434_v57 = vpop.f32.mrb[0].mxu1 }
 0x211   : > { %v435_v58 = vadd.f32 %v526_v56, %v434_v57  ;;  %v632_v59 = vpop.f32.mrb[1].mxu1 }
 0x213   : > { %438 = vst [vmem:[%s249_s10] sm:$0xff] %v435_v58 }
 0x214 PF: > { %s17_s18 = sadd.s32 1, %s785_s18  }
 0x215   : > { %p14_p9 = scmp.ge.s32.totalorder %s17_s18, 4  }
 0x217   :  { %16 = sbr.rel (!%p14_p9) target bundleno = 2 (0x2), region = 79 }
 0x21e   :  { %458 = vsyncpa [#allocation3], 1 }
 0x21f   :  { %460 = vsyncpa [#allocation3 + $0x1], 1 }
 0x220   :  { %461 = vsyncpa [#allocation5], 1 }

</bundles_post_ra>
